<compile_context>
chip_gen: v5e
topology: v5e:2x2
jax: 0.10.0
libtpu: 0.0.40
codegen_flags: <defaults>
</compile_context>

<pallas_src>
import jax
import jax.numpy as jnp
from jax import lax
from jax.experimental import pallas as pl
from jax.experimental.pallas import tpu as pltpu


def rnn_kernel(x0_ref, mask_ref, v_ref, w_enc_t_ref, b_enc_ref, w_ih_t_ref,
               w_hh_t_ref, w_dec_t_ref, b_dec_ref, out_ref, h_sc, u_sc):
    """One grid step = one (batch block, time chunk).

    x0_ref   : (BB, I)           initial-state input for this batch block
    mask_ref : (BB, 1)           1.0 for real batch rows, 0.0 for padding
    v_ref    : (Tc, BB, I)       time-major chunk of the driving sequence
    w_*_t    : pre-transposed, lane-padded weights (in_dim, out_dim)
    out_ref  : (Tc, BB, O_pad)   time-major output chunk
    h_sc     : (BB, H_pad)       hidden state carried across time chunks
    u_sc     : (Tc, BB, H_pad)   per-chunk input projection (off the h-chain)
    """
    # --- encoder: h_0 = x_0 @ W_enc^T + b_enc, only at the first time chunk ---
    @pl.when(pl.program_id(1) == 0)
    def _():
        h0 = (jnp.dot(x0_ref[...], w_enc_t_ref[...],
                      preferred_element_type=jnp.float32) + b_enc_ref[...])
        h_sc[...] = h0 * mask_ref[...]          # zero the padded batch rows

    Tc = v_ref.shape[0]
    w_ih_t = w_ih_t_ref[...]
    w_hh_t = w_hh_t_ref[...]                    # loop-invariant, loaded once
    w_dec_t = w_dec_t_ref[...]
    b_dec = b_dec_ref[...]

    # --- hoisted input projection for this chunk (independent of h-chain) ---
    for tt in range(Tc):                        # Tc is small & static (grid-chunked)
        u_sc[tt] = jnp.dot(v_ref[tt], w_ih_t, preferred_element_type=jnp.float32)

    # --- recurrence + fused per-step decode ---
    h = h_sc[...]
    for tt in range(Tc):
        pre = u_sc[tt] + jnp.dot(h, w_hh_t, preferred_element_type=jnp.float32)
        h = jnp.maximum(pre, 0.0)               # nonlinearity='relu', bias=False
        # decode immediately: independent of the h-chain, fills MXU latency;
        # O padded to 128 lanes -> dense (BB, 128) store.
        out_ref[tt] = (jnp.dot(h, w_dec_t, preferred_element_type=jnp.float32)
                       + b_dec).astype(out_ref.dtype)

    h_sc[...] = h                               # carry to the next time chunk


def _pad2(w, rows, cols):
    out = jnp.zeros((rows, cols), jnp.float32)
    return out.at[:w.shape[0], :w.shape[1]].set(w.astype(jnp.float32))


def rnn_forward(x0, V, params, *, time_chunk=None):
    """x0: (B, I), V: (B, T, I)  ->  (B, T, O), matching the PyTorch module."""
    B, T, I = V.shape
    H = params["w_hh"].shape[0]
    O = params["w_dec"].shape[0]

    LANE, SUB = 128, 8
    H_pad = ((H + LANE - 1) // LANE) * LANE
    O_pad = ((O + LANE - 1) // LANE) * LANE

    # Batch block: multiple of the f32 sublane tile, capped at 128 rows/block.
    BB = 128 if B >= 128 else ((B + SUB - 1) // SUB) * SUB
    B_pad = ((B + BB - 1) // BB) * BB
    nb = B_pad // BB

    # Time chunk sized against a modest VMEM budget (safe on v5e/v6e/v7x).
    if time_chunk is None:
        budget = 4 * 1024 * 1024
        per_t = BB * (H_pad + 2 * I + 2 * O_pad) * 4
        time_chunk = max(1, budget // per_t)
    Tc = max(1, min(time_chunk, T))
    T_pad = ((T + Tc - 1) // Tc) * Tc
    nt = T_pad // Tc

    f32 = jnp.float32
    # Pad batch; real/pad row mask so h_0 is exactly zero on padded rows.
    x0_p = jnp.zeros((B_pad, I), f32).at[:B].set(x0.astype(f32))
    mask = jnp.zeros((B_pad, 1), f32).at[:B].set(1.0)
    # Time-major padded V (one small fused pad+transpose; I is tiny). The
    # full sequence is streamed into VMEM chunk-by-chunk by the BlockSpec.
    v_p = jnp.zeros((T_pad, B_pad, I), f32).at[:T, :B].set(
        jnp.transpose(V.astype(f32), (1, 0, 2)))

    # Lane-padded, pre-transposed weights: (in_dim, out_dim).
    w_enc_t = _pad2(params["w_enc"].T, I, H_pad)
    b_enc = _pad2(params["b_enc"].reshape(1, H), 1, H_pad)
    w_ih_t = _pad2(params["w_ih"].T, I, H_pad)
    w_hh_t = _pad2(params["w_hh"].T, H_pad, H_pad)
    w_dec_t = _pad2(params["w_dec"].T, H_pad, O_pad)
    b_dec = _pad2(params["b_dec"].reshape(1, O), 1, O_pad)

    def const_spec(shape):
        return pl.BlockSpec(shape, lambda b, t, _s=shape: (0,) * len(_s))

    flops = 2 * B_pad * H_pad * (I + T_pad * (I + H_pad + O_pad))
    bytes_accessed = int(v_p.size + x0_p.size + T_pad * B_pad * O_pad
                         + H_pad * H_pad + H_pad * O_pad
                         + 2 * I * H_pad + H_pad + O_pad) * 4

    out_tm = pl.pallas_call(
        rnn_kernel,
        out_shape=jax.ShapeDtypeStruct((T_pad, B_pad, O_pad), f32),
        grid_spec=pltpu.PrefetchScalarGridSpec(
            num_scalar_prefetch=0,
            grid=(nb, nt),                                   # serial time axis last
            in_specs=[
                pl.BlockSpec((BB, I), lambda b, t: (b, 0)),          # x0
                pl.BlockSpec((BB, 1), lambda b, t: (b, 0)),          # batch mask
                pl.BlockSpec((Tc, BB, I), lambda b, t: (t, b, 0)),   # V, streamed
                const_spec((I, H_pad)),                              # W_enc^T
                const_spec((1, H_pad)),                              # b_enc
                const_spec((I, H_pad)),                              # W_ih^T
                const_spec((H_pad, H_pad)),                          # W_hh^T
                const_spec((H_pad, O_pad)),                          # W_dec^T
                const_spec((1, O_pad)),                              # b_dec
            ],
            out_specs=pl.BlockSpec((Tc, BB, O_pad), lambda b, t: (t, b, 0)),
            scratch_shapes=[
                pltpu.VMEM((BB, H_pad), f32),        # carried hidden state
                pltpu.VMEM((Tc, BB, H_pad), f32),    # per-chunk input projection
            ],
        ),
        compiler_params=pltpu.CompilerParams(
            dimension_semantics=("parallel", "arbitrary"),
            vmem_limit_bytes=32 * 1024 * 1024,
        ),
        cost_estimate=pl.CostEstimate(
            flops=flops, transcendentals=0, bytes_accessed=bytes_accessed),
    )(x0_p, mask, v_p, w_enc_t, b_enc, w_ih_t, w_hh_t, w_dec_t, b_dec)

    out = out_tm[:T, :B, :O]
    return jnp.transpose(out, (1, 0, 2))         # batch_first (B, T, O)


def init_params(key, hidden_size, input_size=2, output_size=2):
    ks = jax.random.split(key, 6)
    s = 0.1
    return {
        # nn.Linear(input_size, hidden_size): weight (H, I), bias (H,)
        "w_enc": s * jax.random.normal(ks[0], (hidden_size, input_size), jnp.float32),
        "b_enc": s * jax.random.normal(ks[1], (hidden_size,), jnp.float32),
        # nn.RNN(input_size, hidden_size, bias=False): weight_ih (H, I), weight_hh (H, H)
        "w_ih": s * jax.random.normal(ks[2], (hidden_size, input_size), jnp.float32),
        "w_hh": s * jax.random.normal(ks[3], (hidden_size, hidden_size), jnp.float32),
        # nn.Linear(hidden_size, output_size): weight (O, H), bias (O,)
        "w_dec": s * jax.random.normal(ks[4], (output_size, hidden_size), jnp.float32),
        "b_dec": s * jax.random.normal(ks[5], (output_size,), jnp.float32),
    }


def rnn_forward_ref(x0, V, params):
    """Pure-JAX reference mirroring the PyTorch forward, for verification."""
    h = x0 @ params["w_enc"].T + params["b_enc"]

    def step(h, x_t):
        h_new = jax.nn.relu(x_t @ params["w_ih"].T + h @ params["w_hh"].T)
        return h_new, h_new

    _, hs = lax.scan(step, h, jnp.transpose(V, (1, 0, 2)))  # hs: (T, B, H)
    out = hs @ params["w_dec"].T + params["b_dec"]
    return jnp.transpose(out, (1, 0, 2))


if __name__ == "__main__":
    B, T, I, H, O = 2, 8, 2, 32, 2
    key = jax.random.PRNGKey(0)
    kx, kv, kp = jax.random.split(key, 3)

    x0 = jax.random.normal(kx, (B, I), jnp.float32)     # x_0: (batch, input_size)
    V = jax.random.normal(kv, (B, T, I), jnp.float32)   # V:   (batch, seq, input_size)
    params = init_params(kp, H, I, O)

    # time_chunk=4 -> grid=(1, 2): exercises the carried hidden state across
    # time chunks as well as the streamed-V / chunked-output path.
    out = rnn_forward(x0, V, params, time_chunk=4)
    out = jax.block_until_ready(out)

    ref = rnn_forward_ref(x0, V, params)
    assert out.shape == (B, T, O)
    assert jnp.allclose(out, ref, atol=1e-5, rtol=1e-5), "mismatch vs reference"

    print("KERNEL_OK")
</pallas_src>

<mosaic_0001>
module attributes {stable_mosaic.version = 11 : i64} {
  func.func @rnn_kernel(%arg0: i32, %arg1: i32, %arg2: memref<8x2xf32, #tpu.memory_space<vmem>>, %arg3: memref<8x1xf32, #tpu.memory_space<vmem>>, %arg4: memref<4x8x2xf32, #tpu.memory_space<vmem>>, %arg5: memref<2x128xf32, #tpu.memory_space<vmem>>, %arg6: memref<1x128xf32, #tpu.memory_space<vmem>>, %arg7: memref<2x128xf32, #tpu.memory_space<vmem>>, %arg8: memref<128x128xf32, #tpu.memory_space<vmem>>, %arg9: memref<128x128xf32, #tpu.memory_space<vmem>>, %arg10: memref<1x128xf32, #tpu.memory_space<vmem>>, %arg11: memref<4x8x128xf32, #tpu.memory_space<vmem>>, %arg12: memref<8x128xf32, #tpu.memory_space<vmem>>, %arg13: memref<4x8x128xf32, #tpu.memory_space<vmem>>) attributes {dimension_semantics = [#tpu.dimension_semantics<parallel>, #tpu.dimension_semantics<arbitrary>], iteration_bounds = array<i64: 1, 2>, scalar_prefetch = 0 : i64, scratch_operands = 2 : i64, tpu.core_type = #tpu.core_type<tc>, window_params = [{transform_indices = @transform_0, window_bounds = array<i64: 8, 2>}, {transform_indices = @transform_1, window_bounds = array<i64: 8, 1>}, {transform_indices = @transform_2, window_bounds = array<i64: 4, 8, 2>}, {pipeline_mode = #tpu.pipeline_mode<synchronous>, transform_indices = @transform_3, window_bounds = array<i64: 2, 128>}, {pipeline_mode = #tpu.pipeline_mode<synchronous>, transform_indices = @transform_4, window_bounds = array<i64: 1, 128>}, {pipeline_mode = #tpu.pipeline_mode<synchronous>, transform_indices = @transform_5, window_bounds = array<i64: 2, 128>}, {pipeline_mode = #tpu.pipeline_mode<synchronous>, transform_indices = @transform_6, window_bounds = array<i64: 128, 128>}, {pipeline_mode = #tpu.pipeline_mode<synchronous>, transform_indices = @transform_7, window_bounds = array<i64: 128, 128>}, {pipeline_mode = #tpu.pipeline_mode<synchronous>, transform_indices = @transform_8, window_bounds = array<i64: 1, 128>}, {transform_indices = @transform_9, window_bounds = array<i64: 4, 8, 128>}]} {
    %c0_i32 = arith.constant 0 : i32
    %0 = arith.cmpi eq, %arg1, %c0_i32 : i32
    %1 = arith.extui %0 : i1 to i32
    %c0_i32_0 = arith.constant 0 : i32
    %2 = arith.cmpi ne, %1, %c0_i32_0 : i32
    scf.if %2 {
      %c0_72 = arith.constant 0 : index
      %c0_73 = arith.constant 0 : index
      %81 = vector.load %arg2[%c0_72, %c0_73] : memref<8x2xf32, #tpu.memory_space<vmem>>, vector<8x2xf32>
      %c0_74 = arith.constant 0 : index
      %c0_75 = arith.constant 0 : index
      %82 = vector.load %arg5[%c0_74, %c0_75] : memref<2x128xf32, #tpu.memory_space<vmem>>, vector<2x128xf32>
      %cst_76 = arith.constant dense<0.000000e+00> : vector<8x128xf32>
      %83 = tpu.matmul %81, %82, %cst_76 {dimension_numbers = #tpu.dot_dimension_numbers<[1], [0], [0], [1], [0, 0, 1, 1], [], []>} : vector<8x2xf32>, vector<2x128xf32>, vector<8x128xf32> -> vector<8x128xf32>
      %c0_77 = arith.constant 0 : index
      %c0_78 = arith.constant 0 : index
      %84 = vector.load %arg6[%c0_77, %c0_78] : memref<1x128xf32, #tpu.memory_space<vmem>>, vector<1x128xf32>
      %85 = vector.broadcast %84 : vector<1x128xf32> to vector<8x128xf32>
      %86 = arith.addf %83, %85 : vector<8x128xf32>
      %c0_79 = arith.constant 0 : index
      %c0_80 = arith.constant 0 : index
      %87 = vector.load %arg3[%c0_79, %c0_80] : memref<8x1xf32, #tpu.memory_space<vmem>>, vector<8x1xf32>
      %88 = vector.broadcast %87 : vector<8x1xf32> to vector<8x128xf32>
      %89 = arith.mulf %86, %88 : vector<8x128xf32>
      %c0_81 = arith.constant 0 : index
      %c0_82 = arith.constant 0 : index
      %90 = vector.load %arg12[%c0_81, %c0_82] : memref<8x128xf32, #tpu.memory_space<vmem>>, vector<8x128xf32>
      tpu.vector_store %arg12[%c0_81, %c0_82], %89 {strides = array<i32>} : memref<8x128xf32, #tpu.memory_space<vmem>>, vector<8x128xf32>,
    } else {
    }
    %c0 = arith.constant 0 : index
    %c0_1 = arith.constant 0 : index
    %3 = vector.load %arg7[%c0, %c0_1] : memref<2x128xf32, #tpu.memory_space<vmem>>, vector<2x128xf32>
    %c0_2 = arith.constant 0 : index
    %c0_3 = arith.constant 0 : index
    %4 = vector.load %arg8[%c0_2, %c0_3] : memref<128x128xf32, #tpu.memory_space<vmem>>, vector<128x128xf32>
    %c0_4 = arith.constant 0 : index
    %c0_5 = arith.constant 0 : index
    %5 = vector.load %arg9[%c0_4, %c0_5] : memref<128x128xf32, #tpu.memory_space<vmem>>, vector<128x128xf32>
    %c0_6 = arith.constant 0 : index
    %c0_7 = arith.constant 0 : index
    %6 = vector.load %arg10[%c0_6, %c0_7] : memref<1x128xf32, #tpu.memory_space<vmem>>, vector<1x128xf32>
    %c0_8 = arith.constant 0 : index
    %c0_9 = arith.constant 0 : index
    %c0_10 = arith.constant 0 : index
    %7 = vector.load %arg4[%c0_8, %c0_9, %c0_10] : memref<4x8x2xf32, #tpu.memory_space<vmem>>, vector<1x8x2xf32>
    %8 = vector.shape_cast %7 : vector<1x8x2xf32> to vector<8x2xf32>
    %cst = arith.constant dense<0.000000e+00> : vector<8x128xf32>
    %9 = tpu.matmul %8, %3, %cst {dimension_numbers = #tpu.dot_dimension_numbers<[1], [0], [0], [1], [0, 0, 1, 1], [], []>} : vector<8x2xf32>, vector<2x128xf32>, vector<8x128xf32> -> vector<8x128xf32>
    %c0_11 = arith.constant 0 : index
    %c0_12 = arith.constant 0 : index
    %c0_13 = arith.constant 0 : index
    %10 = vector.load %arg13[%c0_11, %c0_12, %c0_13] : memref<4x8x128xf32, #tpu.memory_space<vmem>>, vector<1x8x128xf32>
    %11 = vector.shape_cast %10 : vector<1x8x128xf32> to vector<8x128xf32>
    %12 = vector.shape_cast %9 : vector<8x128xf32> to vector<1x8x128xf32>
    tpu.vector_store %arg13[%c0_11, %c0_12, %c0_13], %12 {strides = array<i32>} : memref<4x8x128xf32, #tpu.memory_space<vmem>>, vector<1x8x128xf32>,
    %c1 = arith.constant 1 : index
    %c0_14 = arith.constant 0 : index
    %c0_15 = arith.constant 0 : index
    %13 = vector.load %arg4[%c1, %c0_14, %c0_15] : memref<4x8x2xf32, #tpu.memory_space<vmem>>, vector<1x8x2xf32>
    %14 = vector.shape_cast %13 : vector<1x8x2xf32> to vector<8x2xf32>
    %cst_16 = arith.constant dense<0.000000e+00> : vector<8x128xf32>
    %15 = tpu.matmul %14, %3, %cst_16 {dimension_numbers = #tpu.dot_dimension_numbers<[1], [0], [0], [1], [0, 0, 1, 1], [], []>} : vector<8x2xf32>, vector<2x128xf32>, vector<8x128xf32> -> vector<8x128xf32>
    %c1_17 = arith.constant 1 : index
    %c0_18 = arith.constant 0 : index
    %c0_19 = arith.constant 0 : index
    %16 = vector.load %arg13[%c1_17, %c0_18, %c0_19] : memref<4x8x128xf32, #tpu.memory_space<vmem>>, vector<1x8x128xf32>
    %17 = vector.shape_cast %16 : vector<1x8x128xf32> to vector<8x128xf32>
    %18 = vector.shape_cast %15 : vector<8x128xf32> to vector<1x8x128xf32>
    tpu.vector_store %arg13[%c1_17, %c0_18, %c0_19], %18 {strides = array<i32>} : memref<4x8x128xf32, #tpu.memory_space<vmem>>, vector<1x8x128xf32>,
    %c2 = arith.constant 2 : index
    %c0_20 = arith.constant 0 : index
    %c0_21 = arith.constant 0 : index
    %19 = vector.load %arg4[%c2, %c0_20, %c0_21] : memref<4x8x2xf32, #tpu.memory_space<vmem>>, vector<1x8x2xf32>
    %20 = vector.shape_cast %19 : vector<1x8x2xf32> to vector<8x2xf32>
    %cst_22 = arith.constant dense<0.000000e+00> : vector<8x128xf32>
    %21 = tpu.matmul %20, %3, %cst_22 {dimension_numbers = #tpu.dot_dimension_numbers<[1], [0], [0], [1], [0, 0, 1, 1], [], []>} : vector<8x2xf32>, vector<2x128xf32>, vector<8x128xf32> -> vector<8x128xf32>
    %c2_23 = arith.constant 2 : index
    %c0_24 = arith.constant 0 : index
    %c0_25 = arith.constant 0 : index
    %22 = vector.load %arg13[%c2_23, %c0_24, %c0_25] : memref<4x8x128xf32, #tpu.memory_space<vmem>>, vector<1x8x128xf32>
    %23 = vector.shape_cast %22 : vector<1x8x128xf32> to vector<8x128xf32>
    %24 = vector.shape_cast %21 : vector<8x128xf32> to vector<1x8x128xf32>
    tpu.vector_store %arg13[%c2_23, %c0_24, %c0_25], %24 {strides = array<i32>} : memref<4x8x128xf32, #tpu.memory_space<vmem>>, vector<1x8x128xf32>,
    %c3 = arith.constant 3 : index
    %c0_26 = arith.constant 0 : index
    %c0_27 = arith.constant 0 : index
    %25 = vector.load %arg4[%c3, %c0_26, %c0_27] : memref<4x8x2xf32, #tpu.memory_space<vmem>>, vector<1x8x2xf32>
    %26 = vector.shape_cast %25 : vector<1x8x2xf32> to vector<8x2xf32>
    %cst_28 = arith.constant dense<0.000000e+00> : vector<8x128xf32>
    %27 = tpu.matmul %26, %3, %cst_28 {dimension_numbers = #tpu.dot_dimension_numbers<[1], [0], [0], [1], [0, 0, 1, 1], [], []>} : vector<8x2xf32>, vector<2x128xf32>, vector<8x128xf32> -> vector<8x128xf32>
    %c3_29 = arith.constant 3 : index
    %c0_30 = arith.constant 0 : index
    %c0_31 = arith.constant 0 : index
    %28 = vector.load %arg13[%c3_29, %c0_30, %c0_31] : memref<4x8x128xf32, #tpu.memory_space<vmem>>, vector<1x8x128xf32>
    %29 = vector.shape_cast %28 : vector<1x8x128xf32> to vector<8x128xf32>
    %30 = vector.shape_cast %27 : vector<8x128xf32> to vector<1x8x128xf32>
    tpu.vector_store %arg13[%c3_29, %c0_30, %c0_31], %30 {strides = array<i32>} : memref<4x8x128xf32, #tpu.memory_space<vmem>>, vector<1x8x128xf32>,
    %c0_32 = arith.constant 0 : index
    %c0_33 = arith.constant 0 : index
    %31 = vector.load %arg12[%c0_32, %c0_33] : memref<8x128xf32, #tpu.memory_space<vmem>>, vector<8x128xf32>
    %c0_34 = arith.constant 0 : index
    %c0_35 = arith.constant 0 : index
    %c0_36 = arith.constant 0 : index
    %32 = vector.load %arg13[%c0_34, %c0_35, %c0_36] : memref<4x8x128xf32, #tpu.memory_space<vmem>>, vector<1x8x128xf32>
    %33 = vector.shape_cast %32 : vector<1x8x128xf32> to vector<8x128xf32>
    %cst_37 = arith.constant dense<0.000000e+00> : vector<8x128xf32>
    %34 = tpu.matmul %31, %4, %cst_37 {dimension_numbers = #tpu.dot_dimension_numbers<[1], [0], [0], [1], [0, 0, 1, 1], [], []>} : vector<8x128xf32>, vector<128x128xf32>, vector<8x128xf32> -> vector<8x128xf32>
    %35 = arith.addf %33, %34 : vector<8x128xf32>
    %cst_38 = arith.constant 0.000000e+00 : f32
    %36 = vector.broadcast %cst_38 : f32 to vector<8x128xf32>
    %37 = arith.maximumf %35, %36 : vector<8x128xf32>
    %cst_39 = arith.constant dense<0.000000e+00> : vector<8x128xf32>
    %38 = tpu.matmul %37, %5, %cst_39 {dimension_numbers = #tpu.dot_dimension_numbers<[1], [0], [0], [1], [0, 0, 1, 1], [], []>} : vector<8x128xf32>, vector<128x128xf32>, vector<8x128xf32> -> vector<8x128xf32>
    %39 = vector.broadcast %6 : vector<1x128xf32> to vector<8x128xf32>
    %40 = arith.addf %38, %39 : vector<8x128xf32>
    %c0_40 = arith.constant 0 : index
    %c0_41 = arith.constant 0 : index
    %c0_42 = arith.constant 0 : index
    %41 = vector.load %arg11[%c0_40, %c0_41, %c0_42] : memref<4x8x128xf32, #tpu.memory_space<vmem>>, vector<1x8x128xf32>
    %42 = vector.shape_cast %41 : vector<1x8x128xf32> to vector<8x128xf32>
    %43 = vector.shape_cast %40 : vector<8x128xf32> to vector<1x8x128xf32>
    tpu.vector_store %arg11[%c0_40, %c0_41, %c0_42], %43 {strides = array<i32>} : memref<4x8x128xf32, #tpu.memory_space<vmem>>, vector<1x8x128xf32>,
    %c1_43 = arith.constant 1 : index
    %c0_44 = arith.constant 0 : index
    %c0_45 = arith.constant 0 : index
    %44 = vector.load %arg13[%c1_43, %c0_44, %c0_45] : memref<4x8x128xf32, #tpu.memory_space<vmem>>, vector<1x8x128xf32>
    %45 = vector.shape_cast %44 : vector<1x8x128xf32> to vector<8x128xf32>
    %cst_46 = arith.constant dense<0.000000e+00> : vector<8x128xf32>
    %46 = tpu.matmul %37, %4, %cst_46 {dimension_numbers = #tpu.dot_dimension_numbers<[1], [0], [0], [1], [0, 0, 1, 1], [], []>} : vector<8x128xf32>, vector<128x128xf32>, vector<8x128xf32> -> vector<8x128xf32>
    %47 = arith.addf %45, %46 : vector<8x128xf32>
    %cst_47 = arith.constant 0.000000e+00 : f32
    %48 = vector.broadcast %cst_47 : f32 to vector<8x128xf32>
    %49 = arith.maximumf %47, %48 : vector<8x128xf32>
    %cst_48 = arith.constant dense<0.000000e+00> : vector<8x128xf32>
    %50 = tpu.matmul %49, %5, %cst_48 {dimension_numbers = #tpu.dot_dimension_numbers<[1], [0], [0], [1], [0, 0, 1, 1], [], []>} : vector<8x128xf32>, vector<128x128xf32>, vector<8x128xf32> -> vector<8x128xf32>
    %51 = vector.broadcast %6 : vector<1x128xf32> to vector<8x128xf32>
    %52 = arith.addf %50, %51 : vector<8x128xf32>
    %c1_49 = arith.constant 1 : index
    %c0_50 = arith.constant 0 : index
    %c0_51 = arith.constant 0 : index
    %53 = vector.load %arg11[%c1_49, %c0_50, %c0_51] : memref<4x8x128xf32, #tpu.memory_space<vmem>>, vector<1x8x128xf32>
    %54 = vector.shape_cast %53 : vector<1x8x128xf32> to vector<8x128xf32>
    %55 = vector.shape_cast %52 : vector<8x128xf32> to vector<1x8x128xf32>
    tpu.vector_store %arg11[%c1_49, %c0_50, %c0_51], %55 {strides = array<i32>} : memref<4x8x128xf32, #tpu.memory_space<vmem>>, vector<1x8x128xf32>,
    %c2_52 = arith.constant 2 : index
    %c0_53 = arith.constant 0 : index
    %c0_54 = arith.constant 0 : index
    %56 = vector.load %arg13[%c2_52, %c0_53, %c0_54] : memref<4x8x128xf32, #tpu.memory_space<vmem>>, vector<1x8x128xf32>
    %57 = vector.shape_cast %56 : vector<1x8x128xf32> to vector<8x128xf32>
    %cst_55 = arith.constant dense<0.000000e+00> : vector<8x128xf32>
    %58 = tpu.matmul %49, %4, %cst_55 {dimension_numbers = #tpu.dot_dimension_numbers<[1], [0], [0], [1], [0, 0, 1, 1], [], []>} : vector<8x128xf32>, vector<128x128xf32>, vector<8x128xf32> -> vector<8x128xf32>
    %59 = arith.addf %57, %58 : vector<8x128xf32>
    %cst_56 = arith.constant 0.000000e+00 : f32
    %60 = vector.broadcast %cst_56 : f32 to vector<8x128xf32>
    %61 = arith.maximumf %59, %60 : vector<8x128xf32>
    %cst_57 = arith.constant dense<0.000000e+00> : vector<8x128xf32>
    %62 = tpu.matmul %61, %5, %cst_57 {dimension_numbers = #tpu.dot_dimension_numbers<[1], [0], [0], [1], [0, 0, 1, 1], [], []>} : vector<8x128xf32>, vector<128x128xf32>, vector<8x128xf32> -> vector<8x128xf32>
    %63 = vector.broadcast %6 : vector<1x128xf32> to vector<8x128xf32>
    %64 = arith.addf %62, %63 : vector<8x128xf32>
    %c2_58 = arith.constant 2 : index
    %c0_59 = arith.constant 0 : index
    %c0_60 = arith.constant 0 : index
    %65 = vector.load %arg11[%c2_58, %c0_59, %c0_60] : memref<4x8x128xf32, #tpu.memory_space<vmem>>, vector<1x8x128xf32>
    %66 = vector.shape_cast %65 : vector<1x8x128xf32> to vector<8x128xf32>
    %67 = vector.shape_cast %64 : vector<8x128xf32> to vector<1x8x128xf32>
    tpu.vector_store %arg11[%c2_58, %c0_59, %c0_60], %67 {strides = array<i32>} : memref<4x8x128xf32, #tpu.memory_space<vmem>>, vector<1x8x128xf32>,
    %c3_61 = arith.constant 3 : index
    %c0_62 = arith.constant 0 : index
    %c0_63 = arith.constant 0 : index
    %68 = vector.load %arg13[%c3_61, %c0_62, %c0_63] : memref<4x8x128xf32, #tpu.memory_space<vmem>>, vector<1x8x128xf32>
    %69 = vector.shape_cast %68 : vector<1x8x128xf32> to vector<8x128xf32>
    %cst_64 = arith.constant dense<0.000000e+00> : vector<8x128xf32>
    %70 = tpu.matmul %61, %4, %cst_64 {dimension_numbers = #tpu.dot_dimension_numbers<[1], [0], [0], [1], [0, 0, 1, 1], [], []>} : vector<8x128xf32>, vector<128x128xf32>, vector<8x128xf32> -> vector<8x128xf32>
    %71 = arith.addf %69, %70 : vector<8x128xf32>
    %cst_65 = arith.constant 0.000000e+00 : f32
    %72 = vector.broadcast %cst_65 : f32 to vector<8x128xf32>
    %73 = arith.maximumf %71, %72 : vector<8x128xf32>
    %cst_66 = arith.constant dense<0.000000e+00> : vector<8x128xf32>
    %74 = tpu.matmul %73, %5, %cst_66 {dimension_numbers = #tpu.dot_dimension_numbers<[1], [0], [0], [1], [0, 0, 1, 1], [], []>} : vector<8x128xf32>, vector<128x128xf32>, vector<8x128xf32> -> vector<8x128xf32>
    %75 = vector.broadcast %6 : vector<1x128xf32> to vector<8x128xf32>
    %76 = arith.addf %74, %75 : vector<8x128xf32>
    %c3_67 = arith.constant 3 : index
    %c0_68 = arith.constant 0 : index
    %c0_69 = arith.constant 0 : index
    %77 = vector.load %arg11[%c3_67, %c0_68, %c0_69] : memref<4x8x128xf32, #tpu.memory_space<vmem>>, vector<1x8x128xf32>
    %78 = vector.shape_cast %77 : vector<1x8x128xf32> to vector<8x128xf32>
    %79 = vector.shape_cast %76 : vector<8x128xf32> to vector<1x8x128xf32>
    tpu.vector_store %arg11[%c3_67, %c0_68, %c0_69], %79 {strides = array<i32>} : memref<4x8x128xf32, #tpu.memory_space<vmem>>, vector<1x8x128xf32>,
    %c0_70 = arith.constant 0 : index
    %c0_71 = arith.constant 0 : index
    %80 = vector.load %arg12[%c0_70, %c0_71] : memref<8x128xf32, #tpu.memory_space<vmem>>, vector<8x128xf32>
    tpu.vector_store %arg12[%c0_70, %c0_71], %73 {strides = array<i32>} : memref<8x128xf32, #tpu.memory_space<vmem>>, vector<8x128xf32>,
    return
  }
  func.func @transform_0(%arg0: i32, %arg1: i32) -> (i32, i32) {
    %c0_i32 = arith.constant 0 : i32
    %c0_i32_0 = arith.constant 0 : i32
    return %arg0, %c0_i32 : i32, i32
  }
  func.func @transform_1(%arg0: i32, %arg1: i32) -> (i32, i32) {
    %c0_i32 = arith.constant 0 : i32
    %c0_i32_0 = arith.constant 0 : i32
    return %arg0, %c0_i32 : i32, i32
  }
  func.func @transform_2(%arg0: i32, %arg1: i32) -> (i32, i32, i32) {
    %c0_i32 = arith.constant 0 : i32
    %c0_i32_0 = arith.constant 0 : i32
    return %arg1, %arg0, %c0_i32 : i32, i32, i32
  }
  func.func @transform_3(%arg0: i32, %arg1: i32) -> (i32, i32) {
    %c0_i32 = arith.constant 0 : i32
    %c0_i32_0 = arith.constant 0 : i32
    %c0_i32_1 = arith.constant 0 : i32
    return %c0_i32, %c0_i32_0 : i32, i32
  }
  func.func @transform_4(%arg0: i32, %arg1: i32) -> (i32, i32) {
    %c0_i32 = arith.constant 0 : i32
    %c0_i32_0 = arith.constant 0 : i32
    %c0_i32_1 = arith.constant 0 : i32
    return %c0_i32, %c0_i32_0 : i32, i32
  }
  func.func @transform_5(%arg0: i32, %arg1: i32) -> (i32, i32) {
    %c0_i32 = arith.constant 0 : i32
    %c0_i32_0 = arith.constant 0 : i32
    %c0_i32_1 = arith.constant 0 : i32
    return %c0_i32, %c0_i32_0 : i32, i32
  }
  func.func @transform_6(%arg0: i32, %arg1: i32) -> (i32, i32) {
    %c0_i32 = arith.constant 0 : i32
    %c0_i32_0 = arith.constant 0 : i32
    %c0_i32_1 = arith.constant 0 : i32
    return %c0_i32, %c0_i32_0 : i32, i32
  }
  func.func @transform_7(%arg0: i32, %arg1: i32) -> (i32, i32) {
    %c0_i32 = arith.constant 0 : i32
    %c0_i32_0 = arith.constant 0 : i32
    %c0_i32_1 = arith.constant 0 : i32
    return %c0_i32, %c0_i32_0 : i32, i32
  }
  func.func @transform_8(%arg0: i32, %arg1: i32) -> (i32, i32) {
    %c0_i32 = arith.constant 0 : i32
    %c0_i32_0 = arith.constant 0 : i32
    %c0_i32_1 = arith.constant 0 : i32
    return %c0_i32, %c0_i32_0 : i32, i32
  }
  func.func @transform_9(%arg0: i32, %arg1: i32) -> (i32, i32, i32) {
    %c0_i32 = arith.constant 0 : i32
    %c0_i32_0 = arith.constant 0 : i32
    return %arg1, %arg0, %c0_i32 : i32, i32, i32
  }
}

</mosaic_0001>

<bundles_post_ra>
// kernel: tpu_custom_call.1
= control target key start
LH: loop header
LB: loop body
LE: loop exit
PB: predicated region body
PF: predicated region fallthrough
CT: control target
= control target key end

     0   :  { %14 = vsyncpa [#allocation5], 0  ;;  %s1610_s0 = inlined_call_operand.vmem [shape: f32[8,2], index: 0, kind: input, shape index: {}]   ;;  %s1611_s1 = inlined_call_operand.vmem [shape: f32[8,1], index: 1, kind: input, shape index: {}]   ;;  %s1612_s2 = inlined_call_operand.vmem [shape: f32[8,8,2], index: 2, kind: input, shape index: {}]   ;;  %s1613_s3 = inlined_call_operand.vmem [shape: f32[2,128], index: 3, kind: input, shape index: {}]   ;;  %s1614_s4 = inlined_call_operand.vmem [shape: f32[1,128], index: 4, kind: input, shape index: {}]   ;;  %s1615_s5 = inlined_call_operand.vmem [shape: f32[2,128], index: 5, kind: input, shape index: {}]   ;;  %s1616_s6 = inlined_call_operand.hbm [shape: f32[128,128], index: 6, kind: input, shape index: {}]   ;;  %s1617_s7 = inlined_call_operand.hbm [shape: f32[128,128], index: 7, kind: input, shape index: {}]   ;;  %s1618_s8 = inlined_call_operand.vmem [shape: f32[1,128], index: 8, kind: input, shape index: {}]   ;;  %s1619_s9 = inlined_call_operand.hbm [shape: f32[8,8,128], index: 9, kind: output, shape index: {}]  }
   0x1   :  { %15 = vsyncpa [#allocation8], 0 }
   0x2   :  { %16 = vsyncpa [#allocation6], 0 }
   0x3   :  { %18 = vsyncpa [#allocation6 + $0x1], 0  ;;  %s1272_s30 = smov 0   ;;  %s1274_s10 = smov 0  }
   0x4   :  { %s1276_s11 = smov 0   ;;  %s1278_s12 = smov 0  }
   0x5   :  { %s1280_s13 = smov 0   ;;  %s1282_s14 = smov 0  }
   0x6 LB: > { %1622 = sst [smem:[#allocation13_spill]] %s1209_s13  ;;  %s946_s15 = sadd.s32 4294967295, %s1213_s14   ;;  %s1213_s14 = sphi %s1282_s14, %s24_s14   ;;  %s1209_s13 = sphi %s1280_s13, %s1629_s13   ;;  %s1205_s12 = sphi %s1278_s12, %s1628_s12   ;;  %s1201_s11 = sphi %s1276_s11, %s1632_s11   ;;  %s1197_s10 = sphi %s1274_s10, %s1631_s10   ;;  %s1193_s30 = sphi %s1272_s30, %s1630_s30  }
   0x7   : > { %s947_s16 = sadd.s32 4294967294, %s1213_s14   ;;  %s33_s17 = sadd.s32 1, %s1209_s13 }
   0x8   : > { %s251_s18 = sadd.s32 1, %s1201_s11  ;;  %p34_p0 = scmp.ge.s32.totalorder %s33_s17, 2 }
   0x9   : > { %p261_p1 = scmp.ne.s32.totalorder %s1201_s11, %s1197_s10  ;;  %p262_p2 = scmp.eq.s32.totalorder %s946_s15, 1 }
   0xa   : > { %p267_p3 = scmp.ne.s32.totalorder %s1197_s10, %s1193_s30  ;;  %s1634_s17 = smov (%p34_p0, %s33_s17), 0 }
   0xb   : > { %1623 = sst [smem:[#allocation14_spill]] %s1634_s17  ;;  %p1312_p4 = por %p262_p2, %p261_p1 }
   0xc   : > { %p268_p5 = scmp.eq.s32.totalorder %s947_s16, 1  ;;  %s246_s20 = ssub.s32 %s1209_s13, %s1634_s17 }
   0xd   : > { %p948_p6 = scmp.ge.s32.totalorder %s1213_s14, 1  ;;  %p249_p7 = scmp.eq.s32.totalorder %s246_s20, 0 }
   0xe   : > { %p1319_p8 = por %p268_p5, %p267_p3  ;;  %p275_p9 = scmp.lt.s32.totalorder %s1213_s14, 3 }
   0xf   : > { %s1325_s22 = scalar_select %p249_p7, %s1201_s11, %s251_s18  }
  0x10   : > { %p1327_p10 = pnand %p948_p6, %p275_p9  ;;  %p1331_p11 = scmp.eq.s32.totalorder %s946_s15, 0 }
  0x11   : > { %s309_s27 = sshll.u32 %s1616_s6, 4  ;;  %s1215_s28 = smov [#allocation4]   ;;  %s310_s27 = int_to_ptr.hbm [resolvable:$true] %s309_s27 }
  0x12   : > { %p993_p12 = pneg %p1327_p10  ;;  %s311_s29 = sshll.u32 %s1215_s28, 4  ;;  %s312_s29 = int_to_ptr.vmem [resolvable:$true] %s311_s29 }
  0x13   : > { %s323_s15 = sshll.u32 %s1617_s7, 4  ;;  %s1216_s20 = smov 128   ;;  %s324_s15 = int_to_ptr.hbm [resolvable:$true] %s323_s15 }
  0x14   : > { %p994_p13 = pnand %p1331_p11, %p993_p12  ;;  %s1217_s17 = smov 8  }
  0x15   : > { %s1218_s13 = smov [#allocation7]   ;;  %356 = sbr.rel (%p1327_p10) target bundleno = 875 (0x36b), region = 56 }
  0x16   : > { %996 = dma.hbm_to_vmem [thread:$0]  (!%p994_p13), %s310_s27, 2048, %s312_s29, [#allocation5], %s1216_s20, %s1216_s20, %s1217_s17  }
  0x17   : > { %s325_s25 = sshll.u32 %s1218_s13, 4  ;;  %s326_s25 = int_to_ptr.vmem [resolvable:$true] %s325_s25 }
  0x18   : > { %999 = dma.hbm_to_vmem [thread:$0]  (!%p994_p13), %s324_s15, 2048, %s326_s25, [#allocation8], %s1216_s20, %s1216_s20, %s1217_s17  }
  0x1a   : > { %1180 = dma.done.wait (%p1331_p11), [#allocation5], 2048  }
  0x1b   : > { %1182 = vsyncadd (%p1331_p11), [#allocation5], 4294965248 }
  0x1c   : > { %1184 = dma.done.wait (%p1331_p11), [#allocation8], 2048  }
  0x1d   : > { %1186 = vsyncadd (%p1331_p11), [#allocation8], 4294965248  ;;  %s406_s13 = sand.u32 1, %s1197_s10   ;;  %s958_s17 = sshll.u32 %s1205_s12, 2 }
  0x1e   : > { %s957_s23 = sshll.u32 %s406_s13, 5  ;;  %p418_p0 = scmp.lt.s32.totalorder %s958_s17, 7 }
  0x1f   : > { %s1364_s16 = scalar_lea.vmem [#allocation9], %s957_s23  ;;  %p960_p1 = scmp.ne.s32.totalorder %s1205_s12, 0 }
  0x20   : > { %s1636_s17 = smov (!%p418_p0, %s958_s17), 7 }
  0x21   : > { %s959_s26 = sshll.u32 %s1636_s17, 3  ;;  %430 = sbr.rel (%p960_p1) target bundleno = 171 (0xab), region = 68 }
  0x22   : > { %s1362_s29 = scalar_lea.vmem %s1612_s2, %s959_s26 }
  0x26   : > { %v432_v0 = vld [vmem:[%s1613_s3] sm:$0x3]  ;;  %vm441_vm0 = vcmask 1041408   ;;  %vm437_vm1 = vcmask 15360   ;;  %v1219_v2 = vmov 0  }
  0x27   : > { %v431_v1 = vld [vmem:[%s1610_s0] sm:$0xff]  ;;  %961 = vmatpush.msk.msra.mxu0 %vm441_vm0, %v432_v0  ;;  %1064 = vset.pattern.permute.xlu0 %v1219_v2 }
  0x28   : > { %v465_v3 = vld [vmem:[%s1611_s1] sm:$0xff]  ;;  %962 = vmatmul.msk.f32.vlgmr.msra.gmra.mxu0 %vm437_vm1, %v431_v1 }
  0x29   : > { %468 = vperm.xlu0 %1064, %v465_v3   ;;  %v1065_v4 = vld [vmem:[%s1614_s4] ss:$0 sm:$0xff] }
  0x9b   : > { %v469_v6 = vpop.permute.xlu0 %468 }
  0xa5   : > { %v462_v5 = vpop.f32.mrf.mxu0 }
  0xa6   : > { %v463_v7 = vadd.f32 %v1065_v4, %v462_v5 }
  0xa8   : > { %v471_v8 = vmul.f32 %v469_v6, %v463_v7 }
  0xaa   : > { %472 = vst [vmem:[#allocation2] sm:$0xff] %v471_v8 }
  0xab PF: > { %v473_v9 = vld [vmem:[%s1615_s5] sm:$0x3]  ;;  %vm512_vm2 = vcmask 1041408   ;;  %v1384_v11 = vld [vmem:[#allocation4 + $0x70] sm:$0xff]  ;;  %vm508_vm3 = vcmask 15360   ;;  %v1387_v12 = vld [vmem:[#allocation4 + $0x68] sm:$0xff] }
  0xac   : > { %v1382_v10 = vld [vmem:[#allocation4 + $0x78] sm:$0xff]  ;;  %963 = vmatpush.msk.msra.mxu0 %vm512_vm2, %v473_v9  ;;  %966 = vmatpush.msk.msra.mxu1 %vm512_vm2, %v473_v9  ;;  %v1392_v14 = vld [vmem:[#allocation4 + $0x60] sm:$0xff]  ;;  %v1399_v16 = vld [vmem:[#allocation7 + $0x70] sm:$0xff]  ;;  %s982_s18 = sshll.u32 %s1205_s12, 5  ;;  %s816_s17 = sshll.u32 %s1364_s16, 4  ;;  %s817_s17 = int_to_ptr.vmem [resolvable:$true] %s816_s17 }
  0xad   : > { %969 = vmatpush.msk.msra.mxu2 %vm512_vm2, %v473_v9  ;;  %972 = vmatpush.msk.msra.mxu3 %vm512_vm2, %v473_v9  ;;  %v507_v13 = vld [vmem:[%s1362_s29] sm:$0xff]  ;;  %v1406_v18 = vld [vmem:[#allocation7 + $0x68] sm:$0xff]  ;;  %v1409_v19 = vld [vmem:[#allocation4 + $0x50] sm:$0xff]  ;;  %s815_s25 = scalar_lea.hbm %s1619_s9, %s982_s18  ;;  %s803_s26 = scalar_lea.sflag [#allocation6], %s406_s13 }
  0xae   : > { %620 = vmatpush.msrb.mxu0 %v1382_v10  ;;  %v1397_v15 = vld [vmem:[#allocation7 + $0x78] sm:$0xff]  ;;  %v1414_v20 = vld [vmem:[#allocation7 + $0x60] sm:$0xff]  ;;  %v1417_v21 = vld [vmem:[#allocation4 + $0x48] sm:$0xff]  ;;  %s818_s23 = sshll.u32 %s815_s25, 4  ;;  %s1147_s24 = scalar_lea.hbm %s1619_s9, 64  ;;  %s819_s23 = int_to_ptr.hbm [resolvable:$true] %s818_s23 }
  0xaf   : > { %667 = vmatpush.msrb.mxu2 %v1382_v10  ;;  %964 = vmatmul.msk.f32.vlgmr.msra.gmra.mxu0 %vm508_vm3, %v507_v13  ;;  %v1401_v17 = vld [vmem:[#allocation4 + $0x58] sm:$0xff]  ;;  %v1425_v23 = vld [vmem:[#allocation4 + $0x40] sm:$0xff]  ;;  %v1430_v24 = vld [vmem:[#allocation7 + $0x50] sm:$0xff]  ;;  %s1141_s27 = sshra.s32 %s819_s23, 4  ;;  %s1142_s27 = int_to_ptr.hbm [resolvable:$true] %s1141_s27 }
  0xb0   : > { %621 = vmatpush.msrb.mxu0 %v1384_v11  ;;  %645 = vmatpush.msrb.mxu1 %v1397_v15  ;;  %v1422_v22 = vld [vmem:[#allocation7 + $0x58] sm:$0xff]  ;;  %v1438_v26 = vld [vmem:[#allocation7 + $0x48] sm:$0xff]  ;;  %v1441_v27 = vld [vmem:[#allocation4 + $0x30] sm:$0xff]  ;;  %s1143_s28 = scalar_lea.hbm %s1142_s27, 32  ;;  %p1148_p6 = scmp.lt.s32.totalorder %s1142_s27, %s1619_s9 }
  0xb1   : > { %668 = vmatpush.msrb.mxu2 %v1384_v11  ;;  %689 = vmatpush.msrb.mxu3 %v1397_v15  ;;  %v1433_v25 = vld [vmem:[#allocation4 + $0x38] sm:$0xff]  ;;  %v1446_v28 = vld [vmem:[#allocation7 + $0x40] sm:$0xff]  ;;  %v1449_v29 = vld [vmem:[#allocation4 + $0x28] sm:$0xff]  ;;  %p1144_p2 = scmp.ne.s32.totalorder %s1142_s27, %s1143_s28  ;;  %p1149_p7 = scmp.lt.s32.totalorder %s1147_s24, %s1143_s28 }
  0xb2   : > { %622 = vmatpush.msrb.mxu0 %v1387_v12  ;;  %646 = vmatpush.msrb.mxu1 %v1399_v16  ;;  %v1454_v30 = vld [vmem:[#allocation7 + $0x38] sm:$0xff]  ;;  %v1457_v31 = vld [vmem:[#allocation4 + $0x20] sm:$0xff]  ;;  %v1469_v33 = vld [vmem:[#allocation4 + $0x10] sm:$0xff] }
  0xb3   : > { %669 = vmatpush.msrb.mxu2 %v1387_v12  ;;  %690 = vmatpush.msrb.mxu3 %v1399_v16  ;;  %v1463_v32 = vld [vmem:[#allocation4 + $0x18] sm:$0xff]  ;;  %v1473_v34 = vld [vmem:[#allocation4 + $0x8] sm:$0xff]  ;;  %v1477_v35 = vld [vmem:[#allocation4] sm:$0xff]  ;;  %p1145_p3 = pnand %p1144_p2, %p1312_p4  ;;  %p1150_p9 = por %p1149_p7, %p1148_p6 }
  0xb4   : > { %623 = vmatpush.msrb.mxu0 %v1392_v14  ;;  %647 = vmatpush.msrb.mxu1 %v1406_v18  ;;  %v618_v36 = vld [vmem:[#allocation2] sm:$0xff]  ;;  %v1500_v37 = vld [vmem:[#allocation7 + $0x30] sm:$0xff]  ;;  %v1502_v38 = vld [vmem:[#allocation7 + $0x28] sm:$0xff] }
  0xb5   : > { %670 = vmatpush.msrb.mxu2 %v1392_v14  ;;  %691 = vmatpush.msrb.mxu3 %v1406_v18  ;;  %v965_v39 = vld [vmem:[%s1362_s29 + $0x8] sm:$0xff]  ;;  %v968_v40 = vld [vmem:[%s1362_s29 + $0x10] sm:$0xff]  ;;  %v1514_v42 = vld [vmem:[#allocation7 + $0x18] sm:$0xff]  ;;  %p1146_p5 = pneg %p1145_p3 }
  0xb6   : > { %624 = vmatpush.msrb.mxu0 %v1401_v17  ;;  %648 = vmatpush.msrb.mxu1 %v1414_v20  ;;  %v1508_v41 = vld [vmem:[#allocation7 + $0x20] sm:$0xff]  ;;  %v492_v43 = vld [vmem:[#allocation7 + $0x10] sm:$0xff]  ;;  %v491_v44 = vld [vmem:[#allocation7 + $0x8] sm:$0xff] }
  0xb7   : > { %671 = vmatpush.msrb.mxu2 %v1401_v17  ;;  %692 = vmatpush.msrb.mxu3 %v1414_v20  ;;  %v490_v45 = vld [vmem:[#allocation7] sm:$0xff]  ;;  %v971_v50 = vld [vmem:[%s1362_s29 + $0x18] sm:$0xff]  ;;  %v1066_v53 = vld [vmem:[%s1618_s8] ss:$0 sm:$0xff]  ;;  %p1151_p10 = pnand %p1150_p9, %p1146_p5 }
  0xb8   : > { %625 = vmatpush.msrb.mxu0 %v1409_v19  ;;  %649 = vmatpush.msrb.mxu1 %v1422_v22 }
  0xb9   : > { %672 = vmatpush.msrb.mxu2 %v1409_v19  ;;  %693 = vmatpush.msrb.mxu3 %v1422_v22 }
  0xba   : > { %626 = vmatpush.msrb.mxu0 %v1417_v21  ;;  %650 = vmatpush.msrb.mxu1 %v1430_v24 }
  0xbb   : > { %673 = vmatpush.msrb.mxu2 %v1417_v21  ;;  %694 = vmatpush.msrb.mxu3 %v1430_v24 }
  0xbc   : > { %627 = vmatpush.msrb.mxu0 %v1425_v23  ;;  %651 = vmatpush.msrb.mxu1 %v1438_v26 }
  0xbd   : > { %674 = vmatpush.msrb.mxu2 %v1425_v23  ;;  %695 = vmatpush.msrb.mxu3 %v1438_v26 }
  0xbe   : > { %628 = vmatpush.msrb.mxu0 %v1433_v25  ;;  %652 = vmatpush.msrb.mxu1 %v1446_v28 }
  0xbf   : > { %675 = vmatpush.msrb.mxu2 %v1433_v25  ;;  %696 = vmatpush.msrb.mxu3 %v1446_v28 }
  0xc0   : > { %629 = vmatpush.msrb.mxu0 %v1441_v27  ;;  %653 = vmatpush.msrb.mxu1 %v1454_v30 }
  0xc1   : > { %676 = vmatpush.msrb.mxu2 %v1441_v27  ;;  %697 = vmatpush.msrb.mxu3 %v1454_v30 }
  0xc2   : > { %630 = vmatpush.msrb.mxu0 %v1449_v29  ;;  %654 = vmatpush.msrb.mxu1 %v1500_v37 }
  0xc3   : > { %677 = vmatpush.msrb.mxu2 %v1449_v29  ;;  %698 = vmatpush.msrb.mxu3 %v1500_v37 }
  0xc4   : > { %631 = vmatpush.msrb.mxu0 %v1457_v31  ;;  %967 = vmatmul.msk.f32.vlgmr.msra.gmra.mxu1 %vm508_vm3, %v965_v39 }
  0xc5   : > { %678 = vmatpush.msrb.mxu2 %v1457_v31  ;;  %655 = vmatpush.msrb.mxu1 %v1502_v38 }
  0xc6   : > { %632 = vmatpush.msrb.mxu0 %v1463_v32  ;;  %970 = vmatmul.msk.f32.vlgmr.msra.gmra.mxu2 %vm508_vm3, %v968_v40 }
  0xc7   : > { %679 = vmatpush.msrb.mxu2 %v1463_v32  ;;  %699 = vmatpush.msrb.mxu3 %v1502_v38 }
  0xc8   : > { %633 = vmatpush.msrb.mxu0 %v1469_v33  ;;  %656 = vmatpush.msrb.mxu1 %v1508_v41 }
  0xc9   : > { %680 = vmatpush.msrb.mxu2 %v1469_v33  ;;  %700 = vmatpush.msrb.mxu3 %v1508_v41 }
  0xca   : > { %634 = vmatpush.msrb.mxu0 %v1473_v34  ;;  %657 = vmatpush.msrb.mxu1 %v1514_v42 }
  0xcb   : > { %681 = vmatpush.msrb.mxu2 %v1473_v34  ;;  %701 = vmatpush.msrb.mxu3 %v1514_v42 }
  0xcc   : > { %635 = vmatpush.msrb.mxu0 %v1477_v35  ;;  %658 = vmatpush.msrb.mxu1 %v492_v43 }
  0xcd   : > { %636 = vmatmul.f32.vlgmr.msrb.gmra.mxu0 %v618_v36  ;;  %682 = vmatpush.msrb.mxu2 %v1477_v35 }
  0xce   : > { %712 = vmatpush.msra.mxu0 %v1382_v10  ;;  %702 = vmatpush.msrb.mxu3 %v492_v43 }
  0xcf   : > { %757 = vmatpush.msra.mxu2 %v1382_v10  ;;  %659 = vmatpush.msrb.mxu1 %v491_v44 }
  0xd0   : > { %713 = vmatpush.msra.mxu0 %v1384_v11  ;;  %703 = vmatpush.msrb.mxu3 %v491_v44 }
  0xd1   : > { %758 = vmatpush.msra.mxu2 %v1384_v11  ;;  %660 = vmatpush.msrb.mxu1 %v490_v45 }
  0xd2   : > { %714 = vmatpush.msra.mxu0 %v1387_v12  ;;  %704 = vmatpush.msrb.mxu3 %v490_v45 }
  0xd3   : > { %759 = vmatpush.msra.mxu2 %v1387_v12  ;;  %734 = vmatpush.msra.mxu1 %v1397_v15 }
  0xd4   : > { %715 = vmatpush.msra.mxu0 %v1392_v14  ;;  %973 = vmatmul.msk.f32.vlgmr.msra.gmra.mxu3 %vm508_vm3, %v971_v50 }
  0xd5   : > { %760 = vmatpush.msra.mxu2 %v1392_v14  ;;  %735 = vmatpush.msra.mxu1 %v1399_v16 }
  0xd6   : > { %716 = vmatpush.msra.mxu0 %v1401_v17  ;;  %779 = vmatpush.msra.mxu3 %v1397_v15 }
  0xd7   : > { %761 = vmatpush.msra.mxu2 %v1401_v17  ;;  %736 = vmatpush.msra.mxu1 %v1406_v18 }
  0xd8   : > { %717 = vmatpush.msra.mxu0 %v1409_v19  ;;  %780 = vmatpush.msra.mxu3 %v1399_v16 }
  0xd9   : > { %762 = vmatpush.msra.mxu2 %v1409_v19  ;;  %737 = vmatpush.msra.mxu1 %v1414_v20 }
  0xda   : > { %718 = vmatpush.msra.mxu0 %v1417_v21  ;;  %781 = vmatpush.msra.mxu3 %v1406_v18 }
  0xdb   : > { %763 = vmatpush.msra.mxu2 %v1417_v21  ;;  %738 = vmatpush.msra.mxu1 %v1422_v22 }
  0xdc   : > { %719 = vmatpush.msra.mxu0 %v1425_v23  ;;  %782 = vmatpush.msra.mxu3 %v1414_v20 }
  0xdd   : > { %764 = vmatpush.msra.mxu2 %v1425_v23  ;;  %739 = vmatpush.msra.mxu1 %v1430_v24 }
  0xde   : > { %720 = vmatpush.msra.mxu0 %v1433_v25  ;;  %783 = vmatpush.msra.mxu3 %v1422_v22 }
  0xdf   : > { %765 = vmatpush.msra.mxu2 %v1433_v25  ;;  %740 = vmatpush.msra.mxu1 %v1438_v26 }
  0xe0   : > { %721 = vmatpush.msra.mxu0 %v1441_v27  ;;  %784 = vmatpush.msra.mxu3 %v1430_v24 }
  0xe1   : > { %766 = vmatpush.msra.mxu2 %v1441_v27  ;;  %741 = vmatpush.msra.mxu1 %v1446_v28 }
  0xe2   : > { %722 = vmatpush.msra.mxu0 %v1449_v29  ;;  %785 = vmatpush.msra.mxu3 %v1438_v26 }
  0xe3   : > { %767 = vmatpush.msra.mxu2 %v1449_v29  ;;  %742 = vmatpush.msra.mxu1 %v1454_v30 }
  0xe4   : > { %723 = vmatpush.msra.mxu0 %v1457_v31  ;;  %786 = vmatpush.msra.mxu3 %v1446_v28 }
  0xe5   : > { %768 = vmatpush.msra.mxu2 %v1457_v31  ;;  %743 = vmatpush.msra.mxu1 %v1500_v37 }
  0xe6   : > { %724 = vmatpush.msra.mxu0 %v1463_v32  ;;  %787 = vmatpush.msra.mxu3 %v1454_v30 }
  0xe7   : > { %769 = vmatpush.msra.mxu2 %v1463_v32  ;;  %744 = vmatpush.msra.mxu1 %v1502_v38 }
  0xe8   : > { %725 = vmatpush.msra.mxu0 %v1469_v33  ;;  %788 = vmatpush.msra.mxu3 %v1500_v37 }
  0xe9   : > { %770 = vmatpush.msra.mxu2 %v1469_v33  ;;  %745 = vmatpush.msra.mxu1 %v1508_v41 }
  0xea   : > { %726 = vmatpush.msra.mxu0 %v1473_v34  ;;  %789 = vmatpush.msra.mxu3 %v1502_v38 }
  0xeb   : > { %771 = vmatpush.msra.mxu2 %v1473_v34  ;;  %746 = vmatpush.msra.mxu1 %v1514_v42 }
  0xec   : > { %727 = vmatpush.msra.mxu0 %v1477_v35  ;;  %790 = vmatpush.msra.mxu3 %v1508_v41 }
  0xed   : > { %772 = vmatpush.msra.mxu2 %v1477_v35  ;;  %747 = vmatpush.msra.mxu1 %v492_v43 }
  0xee   : > { %791 = vmatpush.msra.mxu3 %v1514_v42 }
  0xef   : > { %748 = vmatpush.msra.mxu1 %v491_v44 }
  0xf0   : > { %792 = vmatpush.msra.mxu3 %v492_v43 }
  0xf1   : > { %749 = vmatpush.msra.mxu1 %v490_v45 }
  0xf2   : > { %793 = vmatpush.msra.mxu3 %v491_v44 }
  0xf4   : > { %794 = vmatpush.msra.mxu3 %v490_v45 }
 0x12c   : > { %v533_v46 = vpop.f32.mrf.mxu0 }
 0x141   : > { %v559_v51 = vpop.f32.mrf.mxu1 }
 0x149   : > { %v586_v52 = vpop.f32.mrf.mxu2 }
 0x14a   : > { %v637_v47 = vpop.f32.mrf.mxu0 }
 0x14b   : > { %v640_v48 = vadd.f32 %v637_v47, %v533_v46 }
 0x14d   : > { %v641_v49 = vmax.f32 %v640_v48, 0.0 }
 0x14f   : > { %661 = vmatmul.f32.vlgmr.msrb.gmra.mxu1 %v641_v49  ;;  %683 = vmatmul.f32.vlgmr.msrb.gmra.mxu2 %v641_v49 }
 0x157   : > { %v613_v59 = vpop.f32.mrf.mxu3 }
 0x1cc   : > { %v662_v54 = vpop.f32.mrf.mxu1 }
 0x1cd   : > { %v663_v55 = vadd.f32 %v1066_v53, %v662_v54 }
 0x1cf   : > { %665 = vst [vmem:[%s1364_s16] sm:$0xff] %v663_v55 }
 0x1d2   : > { %v684_v56 = vpop.f32.mrf.mxu2 }
 0x1d3   : > { %v687_v57 = vadd.f32 %v684_v56, %v559_v51 }
 0x1d5   : > { %v688_v58 = vmax.f32 %v687_v57, 0.0 }
 0x1d7   : > { %705 = vmatmul.f32.vlgmr.msrb.gmra.mxu3 %v688_v58  ;;  %728 = vmatmul.f32.vlgmr.msra.gmra.mxu0 %v688_v58 }
 0x254   : > { %v729_v60 = vpop.f32.mrf.mxu0 }
 0x255   : > { %v732_v61 = vadd.f32 %v729_v60, %v586_v52 }
 0x257   : > { %v733_v62 = vmax.f32 %v732_v61, 0.0 }
 0x259   : > { %750 = vmatmul.f32.vlgmr.msra.gmra.mxu1 %v733_v62  ;;  %773 = vmatmul.f32.vlgmr.msra.gmra.mxu2 %v733_v62 }
 0x25a   : > { %v706_v63 = vpop.f32.mrf.mxu3 }
 0x25b   : > { %v707_v0 = vadd.f32 %v1066_v53, %v706_v63 }
 0x25d   : > { %974 = vst [vmem:[%s1364_s16 + $0x8] sm:$0xff] %v707_v0 }
 0x2d6   : > { %v751_v1 = vpop.f32.mrf.mxu1 }
 0x2d7   : > { %v752_v2 = vadd.f32 %v1066_v53, %v751_v1 }
 0x2d9   : > { %975 = vst [vmem:[%s1364_s16 + $0x10] sm:$0xff] %v752_v2 }
 0x2dc   : > { %v774_v3 = vpop.f32.mrf.mxu2 }
 0x2dd   : > { %v777_v4 = vadd.f32 %v774_v3, %v613_v59 }
 0x2df   : > { %v778_v5 = vmax.f32 %v777_v4, 0.0 }
 0x2e1   : > { %801 = vst [vmem:[#allocation2] sm:$0xff] %v778_v5  ;;  %795 = vmatmul.f32.vlgmr.msra.gmra.mxu3 %v778_v5 }
 0x364   : > { %v796_v6 = vpop.f32.mrf.mxu3 }
 0x365   : > { %v797_v7 = vadd.f32 %v1066_v53, %v796_v6 }
 0x367   : > { %976 = vst [vmem:[%s1364_s16 + $0x18] sm:$0xff] %v797_v7 }
 0x368   : > { %1154 = shalt.err (!%p1151_p10)
}
 0x369   : > { %s1220_s13 = smov 128   ;;  %s1221_s16 = smov 8  }
 0x36a   : > { %991 = dma.vmem_to_hbm [thread:$0]  (%p1312_p4), %s817_s17, 512, %s819_s23, %s803_s26, %s1220_s13, %s1220_s13, %s1221_s16  }
 0x36b PF: > { %p1008_p11 = scmp.ge.s32.totalorder %s1213_s14, 2  ;;  %s833_s20 = sand.u32 1, %s1193_s30  }
 0x36c   : > { %s834_s25 = scalar_lea.sflag [#allocation6], %s833_s20 }
 0x36d   : > { %p1001_p12 = pnand %p1008_p11, %p1319_p8 }
 0x36f   : > { %p1002_p13 = pneg %p1001_p12 }
 0x371   : > { %1188 = dma.done.wait (%p1002_p13), %s834_s25, 512  }
 0x372   : > { %1190 = vsyncadd (%p1002_p13), %s834_s25, 4294966784  ;;  %s24_s14 = sadd.s32 1, %s1213_s14   ;;  %s1628_s12 = sld [smem:[#allocation13_spill]] }
 0x373   : > { %p21_p0 = scmp.ge.s32.totalorder %s24_s14, 4   ;;  %s1629_s13 = sld [smem:[#allocation14_spill]] }
 0x374   : > { %s1630_s30 = smov %s1197_s10  ;;  %s1631_s10 = smov %s1201_s11 }
 0x375   : > { %s1632_s11 = smov %s1325_s22  ;;  %23 = sbr.rel (!%p21_p0) target bundleno = 6 (0x6), region = 119 }
 0x37a   :  { %840 = vsyncpa [#allocation5], 1 }
 0x37b   :  { %842 = vsyncpa [#allocation5 + $0x1], 1 }
 0x37c   :  { %843 = vsyncpa [#allocation8], 1 }
 0x37d   :  { %844 = vsyncpa [#allocation6], 1 }
 0x37e   :  { %846 = vsyncpa [#allocation6 + $0x1], 1 }

</bundles_post_ra>
